<compile_context>
chip_gen: v6e
topology: v6e:2x2x1
jax: 0.10.0
libtpu: 0.0.40
codegen_flags: <defaults>
</compile_context>

<pallas_src>
import jax
import jax.numpy as jnp
from jax.experimental import pallas as pl
from jax.experimental.pallas import tpu as pltpu


def _sigmoid_kernel(x_ref, o_ref):
    # exp goes to the EUP, add/div to the VPU; the kernel stays mem-bound.
    o_ref[...] = jax.nn.sigmoid(x_ref[...])


def _pick_row_tile(M: int, N: int, target_block_bytes: int = 2 << 20) -> int:
    """Largest row tile (multiple of 8) whose f32 block is <= target bytes."""
    if M <= 8:
        return M  # full array in one block (full-dim block is always legal)
    rows = max(8, target_block_bytes // (N * 4))
    rows = max(8, (rows // 8) * 8)
    if rows >= M:
        return M  # single block covers everything — no grid overhead
    return rows


def sigmoid_pallas(x: jax.Array) -> jax.Array:
    assert x.ndim == 2 and x.dtype == jnp.float32
    M, N = x.shape

    tm = _pick_row_tile(M, N)
    grid = (pl.cdiv(M, tm),)

    # in + out, double-buffered, plus headroom; clamp for v7x's 64 MiB VMEM.
    block_bytes = tm * N * 4
    vmem_limit = int(min(max(4 * block_bytes + (4 << 20), 32 << 20), 48 << 20))

    return pl.pallas_call(
        _sigmoid_kernel,
        out_shape=jax.ShapeDtypeStruct((M, N), x.dtype),
        grid_spec=pltpu.PrefetchScalarGridSpec(
            num_scalar_prefetch=0,
            grid=grid,
            in_specs=[pl.BlockSpec((tm, N), lambda i: (i, 0))],
            out_specs=pl.BlockSpec((tm, N), lambda i: (i, 0)),
        ),
        compiler_params=pltpu.CompilerParams(
            dimension_semantics=("parallel",),   # rows split across TCs on v7x
            vmem_limit_bytes=vmem_limit,
        ),
        cost_estimate=pl.CostEstimate(
            flops=4 * M * N,
            transcendentals=M * N,
            bytes_accessed=8 * M * N,
        ),
    )(x)


if __name__ == "__main__":
    key = jax.random.PRNGKey(0)

    M, N = 16, 256  # small shape consistent with ([-1, -1], f32)
    x = jax.random.normal(key, (M, N), dtype=jnp.float32)

    out = sigmoid_pallas(x)
    out = jax.block_until_ready(out)

    ref = jax.nn.sigmoid(x)
    assert out.shape == (M, N) and out.dtype == jnp.float32
    assert jnp.allclose(out, ref, atol=1e-6, rtol=1e-6)

    print("KERNEL_OK")
</pallas_src>

<mosaic_0001>
module attributes {stable_mosaic.version = 11 : i64} {
  func.func @_sigmoid_kernel(%arg0: i32, %arg1: memref<16x256xf32, #tpu.memory_space<vmem>>, %arg2: memref<16x256xf32, #tpu.memory_space<vmem>>) attributes {dimension_semantics = [#tpu.dimension_semantics<parallel>], iteration_bounds = array<i64: 1>, scalar_prefetch = 0 : i64, scratch_operands = 0 : i64, tpu.core_type = #tpu.core_type<tc>, window_params = [{transform_indices = @transform_0, window_bounds = array<i64: 16, 256>}, {transform_indices = @transform_1, window_bounds = array<i64: 16, 256>}]} {
    %c0 = arith.constant 0 : index
    %c0_0 = arith.constant 0 : index
    %0 = vector.load %arg1[%c0, %c0_0] : memref<16x256xf32, #tpu.memory_space<vmem>>, vector<16x256xf32>
    %1 = arith.negf %0 : vector<16x256xf32>
    %2 = math.exp %1 : vector<16x256xf32>
    %cst = arith.constant 1.000000e+00 : f32
    %3 = vector.broadcast %cst : f32 to vector<16x256xf32>
    %4 = arith.addf %3, %2 : vector<16x256xf32>
    %5 = arith.divf %3, %4 : vector<16x256xf32>
    %c0_1 = arith.constant 0 : index
    %c0_2 = arith.constant 0 : index
    %6 = vector.load %arg2[%c0_1, %c0_2] : memref<16x256xf32, #tpu.memory_space<vmem>>, vector<16x256xf32>
    tpu.vector_store %arg2[%c0_1, %c0_2], %5 {strides = array<i32>} : memref<16x256xf32, #tpu.memory_space<vmem>>, vector<16x256xf32>,
    return
  }
  func.func @transform_0(%arg0: i32) -> (i32, i32) {
    %c0_i32 = arith.constant 0 : i32
    %c0_i32_0 = arith.constant 0 : i32
    return %arg0, %c0_i32 : i32, i32
  }
  func.func @transform_1(%arg0: i32) -> (i32, i32) {
    %c0_i32 = arith.constant 0 : i32
    %c0_i32_0 = arith.constant 0 : i32
    return %arg0, %c0_i32 : i32, i32
  }
}

</mosaic_0001>

<bundles_post_ra>
// kernel: tpu_custom_call.1
= control target key start
LH: loop header
LB: loop body
LE: loop exit
PB: predicated region body
PF: predicated region fallthrough
CT: control target
= control target key end

     0   :  { %6 = vsyncpa [#allocation3], 0  ;;  %s166_s0 = inlined_call_operand.hbm [shape: f32[16,256], index: 0, kind: input, shape index: {}]   ;;  %s167_s1 = inlined_call_operand.hbm [shape: f32[16,256], index: 1, kind: output, shape index: {}]  }
   0x1   :  { %7 = vsyncpa [#allocation4], 0  ;;  %s140_s6 = smov [#allocation2]  }
   0x2   :  { %s13_s7 = sshll.u32 %s140_s6, 4  ;;  %s14_s7 = int_to_ptr.vmem [resolvable:$true] %s13_s7 }
   0x3   :  { %s104_s8 = scalar_lea.vmem %s14_s7, 512  ;;  %p109_p1 = scmp.lt.s32.totalorder %s14_s7, %s14_s7 }
   0x4   :  { %p105_p0 = scmp.ne.s32.totalorder %s14_s7, %s104_s8  ;;  %p110_p2 = scmp.lt.s32.totalorder %s104_s8, %s104_s8 }
   0x6   :  { %p111_p3 = por %p110_p2, %p109_p1 }
   0x8   :  { %p112_p4 = pnand %p111_p3, %p105_p0 }
   0xa   :  { %115 = shalt.err (!%p112_p4)
}
   0xb   :  { %s141_s9 = smov 256   ;;  %s142_s10 = smov 16  }
   0xc   :  { %19 = dma.hbm_to_vmem [thread:$0]  %s166_s0, 512, %s14_s7, [#allocation3], %s141_s9, %s141_s9, %s142_s10  }
   0xd   :  { %136 = dma.done.wait [#allocation3], 512  }
   0xe   :  { %137 = vsyncadd [#allocation3], 4294966784  ;;  %v23_v0 = vld [vmem:[#allocation2] sm:$0xff]  ;;  %v24_v1 = vld [vmem:[#allocation2 + $0x8] sm:$0xff]  ;;  %s143_s0 = smov [#allocation5]  }
   0xf   :  { %v25_v2 = vld [vmem:[#allocation2 + $0x10] sm:$0xff]  ;;  %v72_v3 = vmul.f32 -1.442695, %v23_v0  ;;  %v73_v4 = vmul.f32 -1.442695, %v24_v1  ;;  %v26_v6 = vld [vmem:[#allocation2 + $0x18] sm:$0xff] }
  0x10   :  { %v74_v5 = vmul.f32 -1.442695, %v25_v2  ;;  %v75_v7 = vmul.f32 -1.442695, %v26_v6  ;;  %s60_s13 = sshll.u32 %s143_s0, 4  ;;  %s61_s13 = int_to_ptr.vmem [resolvable:$true] %s60_s13 }
  0x11   :  { %80 = vpow2.f32 %v72_v3  ;;  %s116_s14 = scalar_lea.vmem %s61_s13, 512  ;;  %p121_p6 = scmp.lt.s32.totalorder %s61_s13, %s61_s13 }
  0x12   :  { %82 = vpow2.f32 %v73_v4  ;;  %p117_p5 = scmp.ne.s32.totalorder %s61_s13, %s116_s14  ;;  %p122_p7 = scmp.lt.s32.totalorder %s116_s14, %s116_s14 }
  0x13   :  { %84 = vpow2.f32 %v74_v5 }
  0x14   :  { %86 = vpow2.f32 %v75_v7  ;;  %p123_p8 = por %p122_p7, %p121_p6 }
  0x16   :  { %p124_p9 = pnand %p123_p8, %p117_p5 }
  0x1e   :  { %v81_v8 = vpop.eup %80 }
  0x1f   :  { %v83_v9 = vpop.eup %82  ;;  %v39_v10 = vadd.f32 1.0, %v81_v8 }
  0x20   :  { %v85_v11 = vpop.eup %84  ;;  %v40_v12 = vadd.f32 1.0, %v83_v9 }
  0x21   :  { %v87_v13 = vpop.eup %86  ;;  %88 = vrcp.f32 %v39_v10  ;;  %v41_v14 = vadd.f32 1.0, %v85_v11 }
  0x22   :  { %90 = vrcp.f32 %v40_v12  ;;  %v42_v15 = vadd.f32 1.0, %v87_v13 }
  0x23   :  { %92 = vrcp.f32 %v41_v14 }
  0x24   :  { %94 = vrcp.f32 %v42_v15 }
  0x2e   :  { %v89_v16 = vpop.eup %88 }
  0x2f   :  { %v91_v17 = vpop.eup %90  ;;  %51 = vst [vmem:[#allocation5] sm:$0xff] %v89_v16 }
  0x30   :  { %v93_v18 = vpop.eup %92  ;;  %52 = vst [vmem:[#allocation5 + $0x8] sm:$0xff] %v91_v17 }
  0x31   :  { %v95_v19 = vpop.eup %94  ;;  %53 = vst [vmem:[#allocation5 + $0x10] sm:$0xff] %v93_v18 }
  0x32   :  { %54 = vst [vmem:[#allocation5 + $0x18] sm:$0xff] %v95_v19 }
  0x33   :  { %127 = shalt.err (!%p124_p9)
}
  0x34   :  { %66 = dma.vmem_to_hbm [thread:$0]  %s61_s13, 512, %s167_s1, [#allocation4], %s141_s9, %s141_s9, %s142_s10  }
  0x35   :  { %138 = dma.done.wait [#allocation4], 512  }
  0x36   :  { %139 = vsyncadd [#allocation4], 4294966784 }
  0x37   :  { %70 = vsyncpa [#allocation3], 1 }
  0x38   :  { %71 = vsyncpa [#allocation4], 1 }

</bundles_post_ra>
